<compile_context>
chip_gen: v5e
topology: v5e:2x2
jax: 0.10.0
libtpu: 0.0.40
codegen_flags: <defaults>
</compile_context>

<pallas_src>
import jax
import jax.numpy as jnp
from jax import lax
from jax.experimental import pallas as pl
from jax.experimental.pallas import tpu as pltpu


# Table sizes up to this fit the VMEM-resident path on every generation
# (v7x has only 64 MiB VMEM per TensorCore; leave room for output buffers).
_RESIDENT_TABLE_BUDGET_BYTES = 24 * 1024 * 1024
_MAX_INFLIGHT_ROW_DMAS = 16


def _round_up(n, m):
    return ((n + m - 1) // m) * m


# ---------------------------------------------------------------------------
# Path 1: VMEM-resident table, in-kernel dynamic-row gather.
# ---------------------------------------------------------------------------
def _embedding_resident_kernel(ids_ref, table_ref, out_ref):
    # ids_ref:   (num_padded,) int32 in SMEM (scalar prefetch).
    # table_ref: (vocab, hidden) full table, resident in VMEM (constant index_map).
    # out_ref:   (T, hidden) dense output block for this chunk of tokens.
    chunk = pl.program_id(0)
    tokens_per_chunk = out_ref.shape[0]
    base = chunk * tokens_per_chunk

    def _gather_row(t, carry):
        tok = ids_ref[base + t]
        out_ref[pl.ds(t, 1), :] = table_ref[pl.ds(tok, 1), :]
        return carry

    if tokens_per_chunk <= 32:
        lax.fori_loop(0, tokens_per_chunk, _gather_row, 0, unroll=True)
    else:
        lax.fori_loop(0, tokens_per_chunk, _gather_row, 0)


# ---------------------------------------------------------------------------
# Path 2: table stays in HBM; manual per-row DMA gather with K copies in flight.
# ---------------------------------------------------------------------------
def _embedding_hbm_gather_kernel(ids_ref, table_hbm, out_ref, rows_vmem, sems):
    # ids_ref:    (num_padded,) int32 in SMEM (scalar prefetch).
    # table_hbm:  (vocab, hidden) table left in HBM (memory_space=pl.ANY).
    # out_ref:    (T, hidden) dense output block.
    # rows_vmem:  (T, hidden) VMEM scratch for the gathered rows.
    # sems:       (K,) DMA semaphores -> up to K row fetches in flight.
    chunk = pl.program_id(0)
    tokens_per_chunk = out_ref.shape[0]
    in_flight = sems.shape[0]
    base = chunk * tokens_per_chunk

    def _start(t):
        tok = ids_ref[base + t]
        pltpu.make_async_copy(
            table_hbm.at[tok], rows_vmem.at[t], sems.at[t % in_flight]
        ).start()

    def _wait(t):
        # Dummy src of matching shape; the wait only needs dst/sem + byte count.
        pltpu.make_async_copy(
            table_hbm.at[0], rows_vmem.at[t], sems.at[t % in_flight]
        ).wait()

    # Prime the pipeline with up to `in_flight` outstanding row fetches.
    def _prime(t, carry):
        _start(t)
        return carry

    lax.fori_loop(0, min(in_flight, tokens_per_chunk), _prime, 0)

    # Wait for row t; keep the ring full by starting row t + in_flight.
    def _body(t, carry):
        _wait(t)

        @pl.when(t + in_flight < tokens_per_chunk)
        def _():
            _start(t + in_flight)

        return carry

    lax.fori_loop(0, tokens_per_chunk, _body, 0)

    # One dense (T, hidden) store; the HBM writeback is a full sublane/lane-dense block.
    out_ref[...] = rows_vmem[...]


# ---------------------------------------------------------------------------
# Wrapper
# ---------------------------------------------------------------------------
def embedding_text(input_ids, table, *, max_chunk_tokens=256, force_hbm_gather=False):
    """Pallas equivalent of EmbeddingText.forward.

    input_ids: integer array of any shape (token ids).
    table:     (vocab, hidden) embedding matrix.
    Returns    array of shape input_ids.shape + (hidden,), dtype = table.dtype.
    """
    vocab, hidden = table.shape
    itemsize = jnp.dtype(table.dtype).itemsize
    table_bytes = vocab * hidden * itemsize

    # Clamp ids so an out-of-range / padding id can never drive a DMA OOB.
    ids_flat = jnp.clip(input_ids.reshape(-1).astype(jnp.int32), 0, vocab - 1)
    num_tokens = int(ids_flat.shape[0])

    # Sublane packing for the output dtype: f32 -> 8, bf16 -> 16, int8 -> 32.
    pack = max(8, 32 // itemsize)
    chunk = max(pack, (max_chunk_tokens // pack) * pack)
    chunk = min(chunk, _round_up(num_tokens, pack))
    num_padded = _round_up(num_tokens, chunk)
    pad = num_padded - num_tokens
    if pad:
        ids_flat = jnp.concatenate([ids_flat, jnp.zeros((pad,), jnp.int32)])

    grid = (num_padded // chunk,)
    out_block_bytes = chunk * hidden * itemsize
    out_spec = pl.BlockSpec((chunk, hidden), lambda i, ids: (i, 0))
    out_shape = jax.ShapeDtypeStruct((num_padded, hidden), table.dtype)

    use_resident = (not force_hbm_gather) and table_bytes <= _RESIDENT_TABLE_BUDGET_BYTES

    if use_resident:
        kernel = _embedding_resident_kernel
        # Constant block index -> table is DMA'd into VMEM once and stays resident.
        in_specs = [pl.BlockSpec((vocab, hidden), lambda i, ids: (0, 0))]
        scratch_shapes = []
        vmem_limit = 2 * table_bytes + 4 * out_block_bytes + (2 << 20)
        bytes_accessed = table_bytes + num_padded * hidden * itemsize + num_padded * 4
    else:
        kernel = _embedding_hbm_gather_kernel
        in_specs = [pl.BlockSpec(memory_space=pl.ANY)]  # table stays in HBM
        in_flight = min(_MAX_INFLIGHT_ROW_DMAS, chunk)
        scratch_shapes = [
            pltpu.VMEM((chunk, hidden), table.dtype),
            pltpu.SemaphoreType.DMA((in_flight,)),
        ]
        vmem_limit = chunk * hidden * itemsize + 4 * out_block_bytes + (2 << 20)
        bytes_accessed = 2 * num_padded * hidden * itemsize + num_padded * 4

    vmem_limit = int(min(max(vmem_limit, 8 << 20), 100 << 20))

    out = pl.pallas_call(
        kernel,
        out_shape=out_shape,
        grid_spec=pltpu.PrefetchScalarGridSpec(
            num_scalar_prefetch=1,          # token ids land in SMEM before the grid
            grid=grid,                      # one chunk of T tokens per grid step
            in_specs=in_specs,
            out_specs=out_spec,
            scratch_shapes=scratch_shapes,
        ),
        compiler_params=pltpu.CompilerParams(
            # Parallel token axis -> sharded across the two TensorCores on v7x.
            dimension_semantics=("parallel",),
            vmem_limit_bytes=vmem_limit,
        ),
        cost_estimate=pl.CostEstimate(
            flops=0, transcendentals=0, bytes_accessed=int(bytes_accessed)
        ),
    )(ids_flat, table)

    out = out[:num_tokens]
    return out.reshape(*input_ids.shape, hidden)


if __name__ == "__main__":
    key = jax.random.PRNGKey(0)
    k_table, k_ids = jax.random.split(key)

    # Small shapes consistent with the module: (batch, seq) token ids,
    # (vocab, hidden) embedding table.
    # TODO(synk): the real ChatTTS GPT `emb_text` weights come from a checkpoint;
    # a random table with the same semantics is used here.
    batch, seq = 2, 8
    vocab, hidden = 512, 256
    table = jax.random.normal(k_table, (vocab, hidden), dtype=jnp.float32)
    input_ids = jax.random.randint(k_ids, (batch, seq), 0, vocab, dtype=jnp.int32)

    ref = table[input_ids]  # plain embedding lookup (nn.Embedding forward)

    # Path 1: VMEM-resident table (auto-selected). Small chunk -> 2 grid steps.
    emb = embedding_text(input_ids, table, max_chunk_tokens=8)
    jax.block_until_ready(emb)
    assert emb.shape == (batch, seq, hidden)
    assert emb.dtype == table.dtype
    assert bool(jnp.all(emb == ref))

    # Path 2: large-table fallback (manual HBM row-gather DMAs), forced here to
    # verify it on the same data.
    emb_hbm = embedding_text(input_ids, table, max_chunk_tokens=8, force_hbm_gather=True)
    jax.block_until_ready(emb_hbm)
    assert bool(jnp.all(emb_hbm == ref))

    print("KERNEL_OK")
</pallas_src>

<mosaic_0001>
module attributes {stable_mosaic.version = 11 : i64} {
  func.func @_embedding_resident_kernel(%arg0: i32, %arg1: memref<16xi32, #tpu.memory_space<smem>>, %arg2: memref<512x256xf32, #tpu.memory_space<vmem>>, %arg3: memref<8x256xf32, #tpu.memory_space<vmem>>) attributes {dimension_semantics = [#tpu.dimension_semantics<parallel>], iteration_bounds = array<i64: 2>, scalar_prefetch = 1 : i64, scratch_operands = 0 : i64, tpu.core_type = #tpu.core_type<tc>, window_params = [{pipeline_mode = #tpu.pipeline_mode<synchronous>, transform_indices = @transform_0, window_bounds = array<i64: 512, 256>}, {transform_indices = @transform_1, window_bounds = array<i64: 8, 256>}]} {
    %c8_i32 = arith.constant 8 : i32
    %0 = arith.muli %arg0, %c8_i32 : i32
    %c0_i32 = arith.constant 0 : i32
    %1 = arith.addi %0, %c0_i32 : i32
    %2 = arith.index_cast %1 : i32 to index
    %3 = memref.load %arg1[%2] : memref<16xi32, #tpu.memory_space<smem>>
    %4 = arith.index_cast %3 : i32 to index
    %c0 = arith.constant 0 : index
    %5 = vector.load %arg2[%4, %c0] : memref<512x256xf32, #tpu.memory_space<vmem>>, vector<1x256xf32>
    %6 = arith.index_cast %c0_i32 : i32 to index
    %c0_0 = arith.constant 0 : index
    %7 = vector.load %arg3[%6, %c0_0] : memref<8x256xf32, #tpu.memory_space<vmem>>, vector<1x256xf32>
    tpu.vector_store %arg3[%6, %c0_0], %5 {strides = array<i32>} : memref<8x256xf32, #tpu.memory_space<vmem>>, vector<1x256xf32>,
    %c1_i32 = arith.constant 1 : i32
    %8 = arith.addi %0, %c1_i32 : i32
    %9 = arith.index_cast %8 : i32 to index
    %10 = memref.load %arg1[%9] : memref<16xi32, #tpu.memory_space<smem>>
    %11 = arith.index_cast %10 : i32 to index
    %c0_1 = arith.constant 0 : index
    %12 = vector.load %arg2[%11, %c0_1] : memref<512x256xf32, #tpu.memory_space<vmem>>, vector<1x256xf32>
    %13 = arith.index_cast %c1_i32 : i32 to index
    %c0_2 = arith.constant 0 : index
    %14 = vector.load %arg3[%13, %c0_2] : memref<8x256xf32, #tpu.memory_space<vmem>>, vector<1x256xf32>
    tpu.vector_store %arg3[%13, %c0_2], %12 {strides = array<i32>} : memref<8x256xf32, #tpu.memory_space<vmem>>, vector<1x256xf32>,
    %c2_i32 = arith.constant 2 : i32
    %15 = arith.addi %0, %c2_i32 : i32
    %16 = arith.index_cast %15 : i32 to index
    %17 = memref.load %arg1[%16] : memref<16xi32, #tpu.memory_space<smem>>
    %18 = arith.index_cast %17 : i32 to index
    %c0_3 = arith.constant 0 : index
    %19 = vector.load %arg2[%18, %c0_3] : memref<512x256xf32, #tpu.memory_space<vmem>>, vector<1x256xf32>
    %20 = arith.index_cast %c2_i32 : i32 to index
    %c0_4 = arith.constant 0 : index
    %21 = vector.load %arg3[%20, %c0_4] : memref<8x256xf32, #tpu.memory_space<vmem>>, vector<1x256xf32>
    tpu.vector_store %arg3[%20, %c0_4], %19 {strides = array<i32>} : memref<8x256xf32, #tpu.memory_space<vmem>>, vector<1x256xf32>,
    %c3_i32 = arith.constant 3 : i32
    %22 = arith.addi %0, %c3_i32 : i32
    %23 = arith.index_cast %22 : i32 to index
    %24 = memref.load %arg1[%23] : memref<16xi32, #tpu.memory_space<smem>>
    %25 = arith.index_cast %24 : i32 to index
    %c0_5 = arith.constant 0 : index
    %26 = vector.load %arg2[%25, %c0_5] : memref<512x256xf32, #tpu.memory_space<vmem>>, vector<1x256xf32>
    %27 = arith.index_cast %c3_i32 : i32 to index
    %c0_6 = arith.constant 0 : index
    %28 = vector.load %arg3[%27, %c0_6] : memref<8x256xf32, #tpu.memory_space<vmem>>, vector<1x256xf32>
    tpu.vector_store %arg3[%27, %c0_6], %26 {strides = array<i32>} : memref<8x256xf32, #tpu.memory_space<vmem>>, vector<1x256xf32>,
    %c4_i32 = arith.constant 4 : i32
    %29 = arith.addi %0, %c4_i32 : i32
    %30 = arith.index_cast %29 : i32 to index
    %31 = memref.load %arg1[%30] : memref<16xi32, #tpu.memory_space<smem>>
    %32 = arith.index_cast %31 : i32 to index
    %c0_7 = arith.constant 0 : index
    %33 = vector.load %arg2[%32, %c0_7] : memref<512x256xf32, #tpu.memory_space<vmem>>, vector<1x256xf32>
    %34 = arith.index_cast %c4_i32 : i32 to index
    %c0_8 = arith.constant 0 : index
    %35 = vector.load %arg3[%34, %c0_8] : memref<8x256xf32, #tpu.memory_space<vmem>>, vector<1x256xf32>
    tpu.vector_store %arg3[%34, %c0_8], %33 {strides = array<i32>} : memref<8x256xf32, #tpu.memory_space<vmem>>, vector<1x256xf32>,
    %c5_i32 = arith.constant 5 : i32
    %36 = arith.addi %0, %c5_i32 : i32
    %37 = arith.index_cast %36 : i32 to index
    %38 = memref.load %arg1[%37] : memref<16xi32, #tpu.memory_space<smem>>
    %39 = arith.index_cast %38 : i32 to index
    %c0_9 = arith.constant 0 : index
    %40 = vector.load %arg2[%39, %c0_9] : memref<512x256xf32, #tpu.memory_space<vmem>>, vector<1x256xf32>
    %41 = arith.index_cast %c5_i32 : i32 to index
    %c0_10 = arith.constant 0 : index
    %42 = vector.load %arg3[%41, %c0_10] : memref<8x256xf32, #tpu.memory_space<vmem>>, vector<1x256xf32>
    tpu.vector_store %arg3[%41, %c0_10], %40 {strides = array<i32>} : memref<8x256xf32, #tpu.memory_space<vmem>>, vector<1x256xf32>,
    %c6_i32 = arith.constant 6 : i32
    %43 = arith.addi %0, %c6_i32 : i32
    %44 = arith.index_cast %43 : i32 to index
    %45 = memref.load %arg1[%44] : memref<16xi32, #tpu.memory_space<smem>>
    %46 = arith.index_cast %45 : i32 to index
    %c0_11 = arith.constant 0 : index
    %47 = vector.load %arg2[%46, %c0_11] : memref<512x256xf32, #tpu.memory_space<vmem>>, vector<1x256xf32>
    %48 = arith.index_cast %c6_i32 : i32 to index
    %c0_12 = arith.constant 0 : index
    %49 = vector.load %arg3[%48, %c0_12] : memref<8x256xf32, #tpu.memory_space<vmem>>, vector<1x256xf32>
    tpu.vector_store %arg3[%48, %c0_12], %47 {strides = array<i32>} : memref<8x256xf32, #tpu.memory_space<vmem>>, vector<1x256xf32>,
    %c7_i32 = arith.constant 7 : i32
    %50 = arith.addi %0, %c7_i32 : i32
    %51 = arith.index_cast %50 : i32 to index
    %52 = memref.load %arg1[%51] : memref<16xi32, #tpu.memory_space<smem>>
    %53 = arith.index_cast %52 : i32 to index
    %c0_13 = arith.constant 0 : index
    %54 = vector.load %arg2[%53, %c0_13] : memref<512x256xf32, #tpu.memory_space<vmem>>, vector<1x256xf32>
    %55 = arith.index_cast %c7_i32 : i32 to index
    %c0_14 = arith.constant 0 : index
    %56 = vector.load %arg3[%55, %c0_14] : memref<8x256xf32, #tpu.memory_space<vmem>>, vector<1x256xf32>
    tpu.vector_store %arg3[%55, %c0_14], %54 {strides = array<i32>} : memref<8x256xf32, #tpu.memory_space<vmem>>, vector<1x256xf32>,
    %c8_i32_15 = arith.constant 8 : i32
    return
  }
  func.func @transform_0(%arg0: i32, %arg1: memref<16xi32, #tpu.memory_space<smem>>) -> (i32, i32) {
    %c0_i32 = arith.constant 0 : i32
    %c0_i32_0 = arith.constant 0 : i32
    %c0_i32_1 = arith.constant 0 : i32
    return %c0_i32, %c0_i32_0 : i32, i32
  }
  func.func @transform_1(%arg0: i32, %arg1: memref<16xi32, #tpu.memory_space<smem>>) -> (i32, i32) {
    %c0_i32 = arith.constant 0 : i32
    %c0_i32_0 = arith.constant 0 : i32
    return %arg0, %c0_i32 : i32, i32
  }
}

</mosaic_0001>

<bundles_post_ra>
// kernel: tpu_custom_call.1
= control target key start
LH: loop header
LB: loop body
LE: loop exit
PB: predicated region body
PF: predicated region fallthrough
CT: control target
= control target key end

     0   :  { %s545_s12 = smov [#allocation3]   ;;  %s715_s0 = inlined_call_operand.hbm [shape: s32[16], index: 0, kind: input, shape index: {}]   ;;  %s716_s1 = inlined_call_operand.hbm [shape: f32[512,256], index: 1, kind: input, shape index: {}]   ;;  %s717_s2 = inlined_call_operand.hbm [shape: f32[16,256], index: 2, kind: output, shape index: {}]  }
   0x1   :  { %s8_s11 = sshll.u32 %s715_s0, 4  ;;  %s9_s11 = int_to_ptr.hbm [resolvable:$true] %s8_s11 }
   0x2   :  { %11 = dma.hbm_to_smem %s9_s11, 16, %s545_s12, [#allocation2] }
   0x3   :  { %519 = dma.done.wait [#allocation2], 16 }
   0x4   :  { %520 = vsyncadd [#allocation2], 4294967280 }
   0x5   :  { %14 = sfence }
   0x6   :  { %15 = vsyncpa [#allocation5], 0 }
   0x7   :  { %16 = vsyncpa [#allocation6], 0 }
   0x8   :  { %18 = vsyncpa [#allocation6 + $0x1], 0  ;;  %s567_s13 = smov 0   ;;  %s569_s14 = smov 0  }
   0x9   :  { %s571_s15 = smov 0   ;;  %s573_s16 = smov 0  }
   0xa LB: > { %s588_s0 = sadd.s32 4294967295, %s543_s16   ;;  %s336_s17 = sadd.s32 4294967294, %s543_s16   ;;  %s543_s16 = sphi %s573_s16, %s725_s16   ;;  %s539_s15 = sphi %s571_s15, %s724_s15   ;;  %s535_s14 = sphi %s569_s14, %s723_s14   ;;  %s531_s13 = sphi %s567_s13, %s722_s13  }
   0xb   : > { %s592_s18 = sadd.s32 1, %s543_s16   ;;  %s52_s19 = sadd.s32 1, %s539_s15 }
   0xc   : > { %s49_s20 = ssub.s32 %s543_s16, %s592_s18  ;;  %p62_p0 = scmp.ne.s32.totalorder %s539_s15, %s535_s14 }
   0xd   : > { %p50_p1 = scmp.eq.s32.totalorder %s49_s20, 0  ;;  %p63_p2 = scmp.eq.s32.totalorder %s588_s0, 1 }
   0xe   : > { %p68_p3 = scmp.ne.s32.totalorder %s535_s14, %s531_s13  ;;  %p69_p4 = scmp.eq.s32.totalorder %s336_s17, 1 }
   0xf   : > { %s603_s21 = scalar_select %p50_p1, %s539_s15, %s52_s19  }
  0x10   : > { %p605_p5 = por %p63_p2, %p62_p0  ;;  %p609_p6 = por %p69_p4, %p68_p3 }
  0x11   : > { %p337_p7 = scmp.ge.s32.totalorder %s543_s16, 1  ;;  %p76_p8 = scmp.lt.s32.totalorder %s543_s16, 3 }
  0x12   : > { %p394_p9 = scmp.eq.s32.totalorder %s588_s0, 0  ;;  %s87_s26 = sshll.u32 %s716_s1, 4  ;;  %s88_s26 = int_to_ptr.hbm [resolvable:$true] %s87_s26 }
  0x13   : > { %p77_p10 = pnand %p337_p7, %p76_p8  ;;  %s546_s27 = smov [#allocation4]  }
  0x14   : > { %s89_s28 = sshll.u32 %s546_s27, 4  ;;  %s547_s29 = smov 256   ;;  %s90_s28 = int_to_ptr.vmem [resolvable:$true] %s89_s28 }
  0x15   : > { %p386_p11 = pneg %p77_p10  ;;  %s548_s30 = smov 16  }
  0x16   : > { %105 = sbr.rel (%p77_p10) target bundleno = 72 (0x48), region = 24 }
  0x17   : > { %p387_p12 = pnand %p394_p9, %p386_p11 }
  0x19   : > { %389 = dma.hbm_to_vmem [thread:$0]  (!%p387_p12), %s88_s26, 16384, %s90_s28, [#allocation5], %s547_s29, %s547_s29, %s548_s30  }
  0x1b   : > { %522 = dma.done.wait (%p394_p9), [#allocation5], 16384  }
  0x1c   : > { %524 = vsyncadd (%p394_p9), [#allocation5], 4294950912  ;;  %s118_s3 = sand.u32 1, %s535_s14   ;;  %s627_s4 = sshll.u32 %s588_s0, 3  ;;  %v132_v0 = vlaneseq }
  0x1d   : > { %s341_s5 = sshll.u32 %s118_s3, 4  ;;  %s122_s6 = sld [smem:[#allocation3 + %s627_s4]] }
  0x1e   : > { %s138_s7 = sadd.s32 1, %s627_s4  ;;  %s152_s8 = sadd.s32 2, %s627_s4  ;;  %vm641_vm0 = vcmp.lt.s32.totalorder %v132_v0, 256 }
  0x1f   : > { %s139_s9 = sld [smem:[#allocation3 + %s138_s7]]  ;;  %s166_s10 = sadd.s32 3, %s627_s4 }
  0x20   : > { %s153_s11 = sld [smem:[#allocation3 + %s152_s8]]  ;;  %s180_s12 = sadd.s32 4, %s627_s4 }
  0x21   : > { %s636_s17 = sld [smem:[#allocation3 + %s166_s10]]  ;;  %s194_s19 = sadd.s32 5, %s627_s4 }
  0x22   : > { %s639_s26 = sld [smem:[#allocation3 + %s180_s12]]  ;;  %s647_s10 = scalar_lea.vmem [#allocation7], %s341_s5 }
  0x23   : > { %s123_s20 = sshra.s32 %s122_s6, 3  ;;  %s126_s24 = sand.u32 7, %s122_s6 }
  0x24   : > { %s371_s25 = sshll.u32 %s123_s20, 4  ;;  %s645_s28 = sld [smem:[#allocation3 + %s194_s19]] }
  0x25   : > { %s129_s27 = sadd.s32 %s371_s25, %s126_s24  ;;  %s140_s29 = sshra.s32 %s139_s9, 3 }
  0x26   : > { %s130_s30 = scalar_lea.vmem [#allocation4], %s129_s27  ;;  %s143_s7 = sand.u32 7, %s139_s9 }
  0x27   : > { %v131_v2 = vld [vmem:[%s130_s30] ss:$8 sm:$0x3]  ;;  %s372_s8 = sshll.u32 %s140_s29, 4  ;;  %s154_s12 = sshra.s32 %s153_s11, 3 }
  0x28   : > { %136 = vst.msk [vmem:[%s647_s10] ss:$8 sm:$0x3] %vm641_vm0, %v131_v2  ;;  %s146_s6 = sadd.s32 %s372_s8, %s143_s7  ;;  %s157_s19 = sand.u32 7, %s153_s11 }
  0x29   : > { %s147_s20 = scalar_lea.vmem [#allocation4], %s146_s6  ;;  %s373_s24 = sshll.u32 %s154_s12, 4 }
  0x2a   : > { %v148_v3 = vld [vmem:[%s147_s20] ss:$8 sm:$0x3]  ;;  %s168_s9 = sshra.s32 %s636_s17, 3  ;;  %s160_s5 = sadd.s32 %s373_s24, %s157_s19 }
  0x2b   : > { %347 = vst.msk [vmem:[%s647_s10 + $0x1] ss:$8 sm:$0x3] %vm641_vm0, %v148_v3  ;;  %s171_s25 = sand.u32 7, %s636_s17  ;;  %s374_s27 = sshll.u32 %s168_s9, 4 }
  0x2c   : > { %s161_s29 = scalar_lea.vmem [#allocation4], %s160_s5  ;;  %s174_s30 = sadd.s32 %s374_s27, %s171_s25 }
  0x2d   : > { %v162_v4 = vld [vmem:[%s161_s29] ss:$8 sm:$0x3]  ;;  %s182_s7 = sshra.s32 %s639_s26, 3  ;;  %s185_s11 = sand.u32 7, %s639_s26 }
  0x2e   : > { %350 = vst.msk [vmem:[%s647_s10 + $0x2] ss:$8 sm:$0x3] %vm641_vm0, %v162_v4  ;;  %s175_s8 = scalar_lea.vmem [#allocation4], %s174_s30  ;;  %s375_s6 = sshll.u32 %s182_s7, 4 }
  0x2f   : > { %v176_v5 = vld [vmem:[%s175_s8] ss:$8 sm:$0x3]  ;;  %s196_s12 = sshra.s32 %s645_s28, 3  ;;  %s188_s17 = sadd.s32 %s375_s6, %s185_s11 }
  0x30   : > { %353 = vst.msk [vmem:[%s647_s10 + $0x3] ss:$8 sm:$0x3] %vm641_vm0, %v176_v5  ;;  %s199_s19 = sand.u32 7, %s645_s28  ;;  %s376_s20 = sshll.u32 %s196_s12, 4 }
  0x31   : > { %s189_s24 = scalar_lea.vmem [#allocation4], %s188_s17  ;;  %s202_s9 = sadd.s32 %s376_s20, %s199_s19 }
  0x32   : > { %v190_v6 = vld [vmem:[%s189_s24] ss:$8 sm:$0x3]  ;;  %s208_s5 = sadd.s32 6, %s627_s4  ;;  %s203_s25 = scalar_lea.vmem [#allocation4], %s202_s9 }
  0x33   : > { %356 = vst.msk [vmem:[%s647_s10 + $0x4] ss:$8 sm:$0x3] %vm641_vm0, %v190_v6  ;;  %s209_s26 = sld [smem:[#allocation3 + %s208_s5]]  ;;  %s222_s27 = sadd.s32 7, %s627_s4 }
  0x34   : > { %v204_v7 = vld [vmem:[%s203_s25] ss:$8 sm:$0x3]  ;;  %s379_s29 = sshll.u32 %s588_s0, 4  ;;  %s223_s30 = sld [smem:[#allocation3 + %s222_s27]] }
  0x35   : > { %359 = vst.msk [vmem:[%s647_s10 + $0x5] ss:$8 sm:$0x3] %vm641_vm0, %v204_v7  ;;  %s248_s11 = scalar_lea.hbm %s717_s2, %s379_s29  ;;  %s250_s8 = sshll.u32 %s647_s10, 4  ;;  %s251_s8 = int_to_ptr.vmem [resolvable:$true] %s250_s8 }
  0x36   : > { %s252_s19 = sshll.u32 %s248_s11, 4  ;;  %s495_s28 = scalar_lea.hbm %s717_s2, 32  ;;  %s253_s19 = int_to_ptr.hbm [resolvable:$true] %s252_s19 }
  0x37   : > { %s489_s27 = sshra.s32 %s253_s19, 4  ;;  %s490_s27 = int_to_ptr.hbm [resolvable:$true] %s489_s27 }
  0x38   : > { %s491_s29 = scalar_lea.hbm %s490_s27, 16  ;;  %p496_p2 = scmp.lt.s32.totalorder %s490_s27, %s717_s2 }
  0x39   : > { %s210_s6 = sshra.s32 %s209_s26, 3  ;;  %s213_s12 = sand.u32 7, %s209_s26 }
  0x3a   : > { %s377_s17 = sshll.u32 %s210_s6, 4  ;;  %s224_s24 = sshra.s32 %s223_s30, 3 }
  0x3b   : > { %s216_s20 = sadd.s32 %s377_s17, %s213_s12  ;;  %s227_s4 = sand.u32 7, %s223_s30 }
  0x3c   : > { %s217_s0 = scalar_lea.vmem [#allocation4], %s216_s20  ;;  %s378_s9 = sshll.u32 %s224_s24, 4 }
  0x3d   : > { %v218_v8 = vld [vmem:[%s217_s0] ss:$8 sm:$0x3]  ;;  %s230_s5 = sadd.s32 %s378_s9, %s227_s4  ;;  %s237_s26 = scalar_lea.sflag [#allocation6], %s118_s3 }
  0x3e   : > { %362 = vst.msk [vmem:[%s647_s10 + $0x6] ss:$8 sm:$0x3] %vm641_vm0, %v218_v8  ;;  %s231_s25 = scalar_lea.vmem [#allocation4], %s230_s5  ;;  %p492_p13 = scmp.ne.s32.totalorder %s490_s27, %s491_s29 }
  0x3f   : > { %v232_v9 = vld [vmem:[%s231_s25] ss:$8 sm:$0x3]  ;;  %p497_p3 = scmp.lt.s32.totalorder %s495_s28, %s491_s29 }
  0x40   : > { %365 = vst.msk [vmem:[%s647_s10 + $0x7] ss:$8 sm:$0x3] %vm641_vm0, %v232_v9  ;;  %p493_p0 = pnand %p492_p13, %p605_p5 }
  0x41   : > { %p498_p4 = por %p497_p3, %p496_p2 }
  0x42   : > { %p494_p1 = pneg %p493_p0 }
  0x44   : > { %p499_p7 = pnand %p498_p4, %p494_p1 }
  0x46   : > { %502 = shalt.err (!%p499_p7)
}
  0x47   : > { %384 = dma.vmem_to_hbm [thread:$0]  (%p605_p5), %s251_s8, 256, %s253_s19, %s237_s26  }
  0x48 PF: > { %p396_p8 = scmp.ge.s32.totalorder %s543_s16, 2  ;;  %s264_s3 = sand.u32 1, %s531_s13  }
  0x49   : > { %s265_s10 = scalar_lea.sflag [#allocation6], %s264_s3 }
  0x4a   : > { %p391_p9 = pnand %p396_p8, %p609_p6 }
  0x4c   : > { %p392_p10 = pneg %p391_p9 }
  0x4e   : > { %526 = dma.done.wait (%p392_p10), %s265_s10, 256  }
  0x4f   : > { %528 = vsyncadd (%p392_p10), %s265_s10, 4294967040  ;;  %p21_p11 = scmp.ge.s32.totalorder %s592_s18, 4   ;;  %s722_s13 = smov %s535_s14 }
  0x50   : > { %s723_s14 = smov %s539_s15  ;;  %s724_s15 = smov %s603_s21 }
  0x51   : > { %s725_s16 = smov %s592_s18  ;;  %23 = sbr.rel (!%p21_p11) target bundleno = 10 (0xa), region = 76 }
  0x56   :  { %271 = vsyncpa [#allocation5], 1 }
  0x57   :  { %273 = vsyncpa [#allocation5 + $0x1], 1 }
  0x58   :  { %274 = vsyncpa [#allocation6], 1 }
  0x59   :  { %276 = vsyncpa [#allocation6 + $0x1], 1 }

</bundles_post_ra>
